<compile_context>
chip_gen: v7x
topology: tpu7x:2x2x1
jax: 0.10.0
libtpu: 0.0.40
codegen_flags: <defaults>
</compile_context>

<pallas_src>
import jax
import jax.numpy as jnp
from jax import lax
from jax.experimental import pallas as pl
from jax.experimental.pallas import tpu as pltpu
import numpy as np

CHANNELS = 4
TIME = 16
BATCH = 2
KSIZE = 3
DILATIONS = (1, 3, 5)
NEG_SLOPE = 0.1


def _lrelu(v):
    return jnp.where(v >= 0, v, NEG_SLOPE * v)


def _round_up(x, m):
    return (x + m - 1) // m * m


def _make_resblock_kernel(T, Tp, dilations, ksize, compute_dtype):
    """Kernel over a (Cp, N*Tp) activation slab resident in VMEM."""

    def kernel(x_ref, w1_ref, b1_ref, w2_ref, b2_ref, o_ref):
        Cp, L = x_ref.shape
        x = x_ref[...].astype(jnp.float32)                       # (Cp, L)

        # Per-segment time-validity mask, built ONCE and reused by all 6 convs.
        t_in_seg = lax.broadcasted_iota(jnp.int32, (1, L), 1) % Tp
        mask = (t_in_seg < T).astype(jnp.float32)                # (1, L)

        def shifted(h, off):
            # shifted[:, t] = h[:, t + off]; zero-filled at the array ends.
            if off == 0:
                return h
            z = jnp.zeros((Cp, abs(off)), h.dtype)
            if off > 0:
                return jnp.concatenate([h[:, off:], z], axis=1)
            return jnp.concatenate([z, h[:, :off]], axis=1)

        def conv(h, w_ref, b_ref, br, dilation):
            # Fuse the K taps into a single matmul: (Cp, K*Cp) @ (K*Cp, L).
            offs = [(k - (ksize - 1) // 2) * dilation for k in range(ksize)]
            hs = jnp.concatenate([shifted(h, o) for o in offs], axis=0)
            y = jnp.dot(w_ref[br], hs.astype(compute_dtype),
                        preferred_element_type=jnp.float32)
            # Bias everywhere, then re-zero the padded tail of each segment so
            # the zero-"same"-padding invariant holds for the next conv.
            return (y + b_ref[br].astype(jnp.float32)) * mask

        for br, d in enumerate(dilations):
            h = _lrelu(x)
            y = conv(h, w1_ref, b1_ref, br, d)        # dilated conv
            h2 = _lrelu(y)
            y2 = conv(h2, w2_ref, b2_ref, br, 1)      # dilation-1 conv
            x = x + y2

        o_ref[...] = x.astype(o_ref.dtype)

    return kernel


def resblock_pallas(x, w1, b1, w2, b2, *, compute_dtype=jnp.float32):
    """x: (N, C, T); w1/w2: (NB, C_out, C_in, K); b1/b2: (NB, C)."""
    N, C, T = x.shape
    NB, _, _, K = w1.shape
    max_off = (K - 1) * max(DILATIONS) // 2
    Cp = _round_up(max(C, 8), 8)                 # sublane-aligned channels
    Tp = _round_up(T + max_off, 128)             # lane-aligned per-batch segment
    L = N * Tp

    # Zero-pad channels/time and flatten batch into the lane axis: (Cp, N*Tp).
    xp = jnp.zeros((N, Cp, Tp), x.dtype).at[:, :C, :T].set(x)
    x2 = jnp.transpose(xp, (1, 0, 2)).reshape(Cp, L)

    def fuse(w):
        # (NB, C, C, K) -> (NB, Cp, K*Cp) with wf[b, o, k*Cp + i] = w[b, o, i, k]
        wp = jnp.zeros((NB, Cp, Cp, K), jnp.float32).at[:, :C, :C, :].set(w)
        return (jnp.transpose(wp, (0, 1, 3, 2))
                .reshape(NB, Cp, K * Cp)
                .astype(compute_dtype))

    def pad_bias(b):
        # (NB, C) -> (NB, Cp, 1); padded channels get zero bias.
        return jnp.zeros((NB, Cp, 1), jnp.float32).at[:, :C, 0].set(b)

    kernel = _make_resblock_kernel(T, Tp, DILATIONS, K, compute_dtype)

    # Whole problem (~KiB) in VMEM, one grid step; lane-dense (Cp, N*Tp) output.
    # TODO(synk): at production HiFiGAN sizes (C~512, T in the thousands), tile
    # T with a (K-1)*max(d)//2 halo over a ("parallel",) grid axis so v7x's two
    # TensorCores share work and per-step VMEM stays under the scoped budget.
    vmem = pl.BlockSpec(memory_space=pltpu.MemorySpace.VMEM)
    out2 = pl.pallas_call(
        kernel,
        out_shape=jax.ShapeDtypeStruct((Cp, L), x.dtype),
        in_specs=[vmem, vmem, vmem, vmem, vmem],
        out_specs=vmem,
    )(x2, fuse(w1), pad_bias(b1), fuse(w2), pad_bias(b2))

    # Back to (N, C, T).
    return jnp.transpose(out2.reshape(Cp, N, Tp), (1, 0, 2))[:, :C, :T]


def resblock_ref(x, w1, b1, w2, b2):
    """Pure-JAX reference mirroring PyTorch semantics (NCH conv1d)."""
    dn = ("NCH", "OIH", "NCH")
    for i, d in enumerate(DILATIONS):
        pad1 = (KSIZE - 1) * d // 2
        h = _lrelu(x)
        y = lax.conv_general_dilated(h, w1[i], (1,), [(pad1, pad1)],
                                     rhs_dilation=(d,), dimension_numbers=dn)
        y = y + b1[i][None, :, None]
        h2 = _lrelu(y)
        pad2 = (KSIZE - 1) // 2
        y2 = lax.conv_general_dilated(h2, w2[i], (1,), [(pad2, pad2)],
                                      rhs_dilation=(1,), dimension_numbers=dn)
        y2 = y2 + b2[i][None, :, None]
        x = x + y2
    return x


if __name__ == "__main__":
    key = jax.random.PRNGKey(0)
    kx, kw1, kb1, kw2, kb2 = jax.random.split(key, 5)

    NB = len(DILATIONS)
    x = jax.random.normal(kx, (BATCH, CHANNELS, TIME), jnp.float32)
    # Conv1d weight shape: (C_out, C_in, K) per branch.
    w1 = 0.3 * jax.random.normal(kw1, (NB, CHANNELS, CHANNELS, KSIZE), jnp.float32)
    b1 = 0.1 * jax.random.normal(kb1, (NB, CHANNELS), jnp.float32)
    w2 = 0.3 * jax.random.normal(kw2, (NB, CHANNELS, CHANNELS, KSIZE), jnp.float32)
    b2 = 0.1 * jax.random.normal(kb2, (NB, CHANNELS), jnp.float32)

    ref = resblock_ref(x, w1, b1, w2, b2)

    # f32 matmul path: tight match against the conv reference.
    out = jax.block_until_ready(resblock_pallas(x, w1, b1, w2, b2))
    np.testing.assert_allclose(np.asarray(out), np.asarray(ref),
                               rtol=1e-4, atol=1e-4)

    # bf16-in / f32-accumulate matmul path (recommended on v6e/v7x): loose check.
    out_bf16 = jax.block_until_ready(
        resblock_pallas(x, w1, b1, w2, b2, compute_dtype=jnp.bfloat16))
    np.testing.assert_allclose(np.asarray(out_bf16), np.asarray(ref),
                               rtol=1e-1, atol=1e-1)

    print("KERNEL_OK")
</pallas_src>

<mosaic_0001>
module attributes {stable_mosaic.version = 11 : i64} {
  func.func @kernel(%arg0: memref<8x256xf32, #tpu.memory_space<vmem>>, %arg1: memref<3x8x24xf32, #tpu.memory_space<vmem>>, %arg2: memref<3x8x1xf32, #tpu.memory_space<vmem>>, %arg3: memref<3x8x24xf32, #tpu.memory_space<vmem>>, %arg4: memref<3x8x1xf32, #tpu.memory_space<vmem>>, %arg5: memref<8x256xf32, #tpu.memory_space<vmem>>) attributes {dimension_semantics = [], scalar_prefetch = 0 : i64, scratch_operands = 0 : i64, tpu.core_type = #tpu.core_type<tc>} {
    %c0 = arith.constant 0 : index
    %c0_0 = arith.constant 0 : index
    %0 = vector.load %arg0[%c0, %c0_0] : memref<8x256xf32, #tpu.memory_space<vmem>>, vector<8x256xf32>
    %1 = tpu.iota {dimensions = array<i32: 1>} : vector<1x256xi32>
    %c128_i32 = arith.constant 128 : i32
    %c0_i32 = arith.constant 0 : i32
    %2 = arith.cmpi eq, %c128_i32, %c0_i32 : i32
    %c1_i32 = arith.constant 1 : i32
    %3 = arith.select %2, %c1_i32, %c128_i32 : i32
    %4 = vector.broadcast %3 : i32 to vector<1x256xi32>
    %5 = arith.remsi %1, %4 : vector<1x256xi32>
    %c0_i32_1 = arith.constant 0 : i32
    %6 = vector.broadcast %c0_i32_1 : i32 to vector<1x256xi32>
    %7 = arith.cmpi ne, %5, %6 : vector<1x256xi32>
    %c0_i32_2 = arith.constant 0 : i32
    %8 = vector.broadcast %c0_i32_2 : i32 to vector<1x256xi32>
    %9 = arith.cmpi slt, %5, %8 : vector<1x256xi32>
    %c0_i32_3 = arith.constant 0 : i32
    %10 = arith.cmpi slt, %3, %c0_i32_3 : i32
    %11 = vector.broadcast %10 : i1 to vector<1x256xi1>
    %12 = vector.broadcast %11 : vector<1x256xi1> to vector<1x256xi1>
    %13 = arith.xori %9, %12 : vector<1x256xi1>
    %14 = arith.andi %13, %7 : vector<1x256xi1>
    %15 = vector.broadcast %3 : i32 to vector<1x256xi32>
    %16 = arith.addi %5, %15 : vector<1x256xi32>
    %17 = arith.select %14, %16, %5 : vector<1x256xi1>, vector<1x256xi32>
    %c16_i32 = arith.constant 16 : i32
    %18 = vector.broadcast %c16_i32 : i32 to vector<1x256xi32>
    %19 = arith.cmpi slt, %17, %18 : vector<1x256xi32>
    %20 = arith.extui %19 : vector<1x256xi1> to vector<1x256xi32>
    %21 = arith.sitofp %20 : vector<1x256xi32> to vector<1x256xf32>
    %cst = arith.constant 0.000000e+00 : f32
    %22 = vector.broadcast %cst : f32 to vector<8x256xf32>
    %23 = arith.cmpf oge, %0, %22 : vector<8x256xf32>
    %cst_4 = arith.constant 1.000000e-01 : f32
    %24 = vector.broadcast %cst_4 : f32 to vector<8x256xf32>
    %25 = arith.mulf %24, %0 : vector<8x256xf32>
    %26 = arith.select %23, %0, %25 : vector<8x256xi1>, vector<8x256xf32>
    %cst_5 = arith.constant 0.000000e+00 : f32
    %27 = vector.broadcast %cst_5 : f32 to vector<8x1xf32>
    %28 = vector.extract_strided_slice %26 {offsets = [0, 0], sizes = [8, 255], strides = [1, 1]} : vector<8x256xf32> to vector<8x255xf32>
    %29 = tpu.concatenate %27, %28 in 1 : vector<8x1xf32>, vector<8x255xf32> -> vector<8x256xf32>
    %cst_6 = arith.constant 0.000000e+00 : f32
    %30 = vector.broadcast %cst_6 : f32 to vector<8x1xf32>
    %31 = vector.extract_strided_slice %26 {offsets = [0, 1], sizes = [8, 255], strides = [1, 1]} : vector<8x256xf32> to vector<8x255xf32>
    %32 = tpu.concatenate %31, %30 in 1 : vector<8x255xf32>, vector<8x1xf32> -> vector<8x256xf32>
    %33 = tpu.concatenate %29, %26, %32 in 0 : vector<8x256xf32>, vector<8x256xf32>, vector<8x256xf32> -> vector<24x256xf32>
    %c0_7 = arith.constant 0 : index
    %c0_8 = arith.constant 0 : index
    %c0_9 = arith.constant 0 : index
    %34 = vector.load %arg1[%c0_7, %c0_8, %c0_9] : memref<3x8x24xf32, #tpu.memory_space<vmem>>, vector<1x8x24xf32>
    %35 = vector.shape_cast %34 : vector<1x8x24xf32> to vector<8x24xf32>
    %cst_10 = arith.constant dense<0.000000e+00> : vector<8x256xf32>
    %36 = tpu.matmul %35, %33, %cst_10 {dimension_numbers = #tpu.dot_dimension_numbers<[1], [0], [0], [1], [0, 0, 1, 1], [], []>} : vector<8x24xf32>, vector<24x256xf32>, vector<8x256xf32> -> vector<8x256xf32>
    %c0_11 = arith.constant 0 : index
    %c0_12 = arith.constant 0 : index
    %c0_13 = arith.constant 0 : index
    %37 = vector.load %arg2[%c0_11, %c0_12, %c0_13] : memref<3x8x1xf32, #tpu.memory_space<vmem>>, vector<1x8x1xf32>
    %38 = vector.shape_cast %37 : vector<1x8x1xf32> to vector<8x1xf32>
    %39 = vector.broadcast %38 : vector<8x1xf32> to vector<8x256xf32>
    %40 = arith.addf %36, %39 : vector<8x256xf32>
    %41 = vector.broadcast %21 : vector<1x256xf32> to vector<8x256xf32>
    %42 = arith.mulf %40, %41 : vector<8x256xf32>
    %cst_14 = arith.constant 0.000000e+00 : f32
    %43 = vector.broadcast %cst_14 : f32 to vector<8x256xf32>
    %44 = arith.cmpf oge, %42, %43 : vector<8x256xf32>
    %cst_15 = arith.constant 1.000000e-01 : f32
    %45 = vector.broadcast %cst_15 : f32 to vector<8x256xf32>
    %46 = arith.mulf %45, %42 : vector<8x256xf32>
    %47 = arith.select %44, %42, %46 : vector<8x256xi1>, vector<8x256xf32>
    %cst_16 = arith.constant 0.000000e+00 : f32
    %48 = vector.broadcast %cst_16 : f32 to vector<8x1xf32>
    %49 = vector.extract_strided_slice %47 {offsets = [0, 0], sizes = [8, 255], strides = [1, 1]} : vector<8x256xf32> to vector<8x255xf32>
    %50 = tpu.concatenate %48, %49 in 1 : vector<8x1xf32>, vector<8x255xf32> -> vector<8x256xf32>
    %cst_17 = arith.constant 0.000000e+00 : f32
    %51 = vector.broadcast %cst_17 : f32 to vector<8x1xf32>
    %52 = vector.extract_strided_slice %47 {offsets = [0, 1], sizes = [8, 255], strides = [1, 1]} : vector<8x256xf32> to vector<8x255xf32>
    %53 = tpu.concatenate %52, %51 in 1 : vector<8x255xf32>, vector<8x1xf32> -> vector<8x256xf32>
    %54 = tpu.concatenate %50, %47, %53 in 0 : vector<8x256xf32>, vector<8x256xf32>, vector<8x256xf32> -> vector<24x256xf32>
    %c0_18 = arith.constant 0 : index
    %c0_19 = arith.constant 0 : index
    %c0_20 = arith.constant 0 : index
    %55 = vector.load %arg3[%c0_18, %c0_19, %c0_20] : memref<3x8x24xf32, #tpu.memory_space<vmem>>, vector<1x8x24xf32>
    %56 = vector.shape_cast %55 : vector<1x8x24xf32> to vector<8x24xf32>
    %cst_21 = arith.constant dense<0.000000e+00> : vector<8x256xf32>
    %57 = tpu.matmul %56, %54, %cst_21 {dimension_numbers = #tpu.dot_dimension_numbers<[1], [0], [0], [1], [0, 0, 1, 1], [], []>} : vector<8x24xf32>, vector<24x256xf32>, vector<8x256xf32> -> vector<8x256xf32>
    %c0_22 = arith.constant 0 : index
    %c0_23 = arith.constant 0 : index
    %c0_24 = arith.constant 0 : index
    %58 = vector.load %arg4[%c0_22, %c0_23, %c0_24] : memref<3x8x1xf32, #tpu.memory_space<vmem>>, vector<1x8x1xf32>
    %59 = vector.shape_cast %58 : vector<1x8x1xf32> to vector<8x1xf32>
    %60 = vector.broadcast %59 : vector<8x1xf32> to vector<8x256xf32>
    %61 = arith.addf %57, %60 : vector<8x256xf32>
    %62 = vector.broadcast %21 : vector<1x256xf32> to vector<8x256xf32>
    %63 = arith.mulf %61, %62 : vector<8x256xf32>
    %64 = arith.addf %0, %63 : vector<8x256xf32>
    %cst_25 = arith.constant 0.000000e+00 : f32
    %65 = vector.broadcast %cst_25 : f32 to vector<8x256xf32>
    %66 = arith.cmpf oge, %64, %65 : vector<8x256xf32>
    %cst_26 = arith.constant 1.000000e-01 : f32
    %67 = vector.broadcast %cst_26 : f32 to vector<8x256xf32>
    %68 = arith.mulf %67, %64 : vector<8x256xf32>
    %69 = arith.select %66, %64, %68 : vector<8x256xi1>, vector<8x256xf32>
    %cst_27 = arith.constant 0.000000e+00 : f32
    %70 = vector.broadcast %cst_27 : f32 to vector<8x3xf32>
    %71 = vector.extract_strided_slice %69 {offsets = [0, 0], sizes = [8, 253], strides = [1, 1]} : vector<8x256xf32> to vector<8x253xf32>
    %72 = tpu.concatenate %70, %71 in 1 : vector<8x3xf32>, vector<8x253xf32> -> vector<8x256xf32>
    %cst_28 = arith.constant 0.000000e+00 : f32
    %73 = vector.broadcast %cst_28 : f32 to vector<8x3xf32>
    %74 = vector.extract_strided_slice %69 {offsets = [0, 3], sizes = [8, 253], strides = [1, 1]} : vector<8x256xf32> to vector<8x253xf32>
    %75 = tpu.concatenate %74, %73 in 1 : vector<8x253xf32>, vector<8x3xf32> -> vector<8x256xf32>
    %76 = tpu.concatenate %72, %69, %75 in 0 : vector<8x256xf32>, vector<8x256xf32>, vector<8x256xf32> -> vector<24x256xf32>
    %c1 = arith.constant 1 : index
    %c0_29 = arith.constant 0 : index
    %c0_30 = arith.constant 0 : index
    %77 = vector.load %arg1[%c1, %c0_29, %c0_30] : memref<3x8x24xf32, #tpu.memory_space<vmem>>, vector<1x8x24xf32>
    %78 = vector.shape_cast %77 : vector<1x8x24xf32> to vector<8x24xf32>
    %cst_31 = arith.constant dense<0.000000e+00> : vector<8x256xf32>
    %79 = tpu.matmul %78, %76, %cst_31 {dimension_numbers = #tpu.dot_dimension_numbers<[1], [0], [0], [1], [0, 0, 1, 1], [], []>} : vector<8x24xf32>, vector<24x256xf32>, vector<8x256xf32> -> vector<8x256xf32>
    %c1_32 = arith.constant 1 : index
    %c0_33 = arith.constant 0 : index
    %c0_34 = arith.constant 0 : index
    %80 = vector.load %arg2[%c1_32, %c0_33, %c0_34] : memref<3x8x1xf32, #tpu.memory_space<vmem>>, vector<1x8x1xf32>
    %81 = vector.shape_cast %80 : vector<1x8x1xf32> to vector<8x1xf32>
    %82 = vector.broadcast %81 : vector<8x1xf32> to vector<8x256xf32>
    %83 = arith.addf %79, %82 : vector<8x256xf32>
    %84 = vector.broadcast %21 : vector<1x256xf32> to vector<8x256xf32>
    %85 = arith.mulf %83, %84 : vector<8x256xf32>
    %cst_35 = arith.constant 0.000000e+00 : f32
    %86 = vector.broadcast %cst_35 : f32 to vector<8x256xf32>
    %87 = arith.cmpf oge, %85, %86 : vector<8x256xf32>
    %cst_36 = arith.constant 1.000000e-01 : f32
    %88 = vector.broadcast %cst_36 : f32 to vector<8x256xf32>
    %89 = arith.mulf %88, %85 : vector<8x256xf32>
    %90 = arith.select %87, %85, %89 : vector<8x256xi1>, vector<8x256xf32>
    %cst_37 = arith.constant 0.000000e+00 : f32
    %91 = vector.broadcast %cst_37 : f32 to vector<8x1xf32>
    %92 = vector.extract_strided_slice %90 {offsets = [0, 0], sizes = [8, 255], strides = [1, 1]} : vector<8x256xf32> to vector<8x255xf32>
    %93 = tpu.concatenate %91, %92 in 1 : vector<8x1xf32>, vector<8x255xf32> -> vector<8x256xf32>
    %cst_38 = arith.constant 0.000000e+00 : f32
    %94 = vector.broadcast %cst_38 : f32 to vector<8x1xf32>
    %95 = vector.extract_strided_slice %90 {offsets = [0, 1], sizes = [8, 255], strides = [1, 1]} : vector<8x256xf32> to vector<8x255xf32>
    %96 = tpu.concatenate %95, %94 in 1 : vector<8x255xf32>, vector<8x1xf32> -> vector<8x256xf32>
    %97 = tpu.concatenate %93, %90, %96 in 0 : vector<8x256xf32>, vector<8x256xf32>, vector<8x256xf32> -> vector<24x256xf32>
    %c1_39 = arith.constant 1 : index
    %c0_40 = arith.constant 0 : index
    %c0_41 = arith.constant 0 : index
    %98 = vector.load %arg3[%c1_39, %c0_40, %c0_41] : memref<3x8x24xf32, #tpu.memory_space<vmem>>, vector<1x8x24xf32>
    %99 = vector.shape_cast %98 : vector<1x8x24xf32> to vector<8x24xf32>
    %cst_42 = arith.constant dense<0.000000e+00> : vector<8x256xf32>
    %100 = tpu.matmul %99, %97, %cst_42 {dimension_numbers = #tpu.dot_dimension_numbers<[1], [0], [0], [1], [0, 0, 1, 1], [], []>} : vector<8x24xf32>, vector<24x256xf32>, vector<8x256xf32> -> vector<8x256xf32>
    %c1_43 = arith.constant 1 : index
    %c0_44 = arith.constant 0 : index
    %c0_45 = arith.constant 0 : index
    %101 = vector.load %arg4[%c1_43, %c0_44, %c0_45] : memref<3x8x1xf32, #tpu.memory_space<vmem>>, vector<1x8x1xf32>
    %102 = vector.shape_cast %101 : vector<1x8x1xf32> to vector<8x1xf32>
    %103 = vector.broadcast %102 : vector<8x1xf32> to vector<8x256xf32>
    %104 = arith.addf %100, %103 : vector<8x256xf32>
    %105 = vector.broadcast %21 : vector<1x256xf32> to vector<8x256xf32>
    %106 = arith.mulf %104, %105 : vector<8x256xf32>
    %107 = arith.addf %64, %106 : vector<8x256xf32>
    %cst_46 = arith.constant 0.000000e+00 : f32
    %108 = vector.broadcast %cst_46 : f32 to vector<8x256xf32>
    %109 = arith.cmpf oge, %107, %108 : vector<8x256xf32>
    %cst_47 = arith.constant 1.000000e-01 : f32
    %110 = vector.broadcast %cst_47 : f32 to vector<8x256xf32>
    %111 = arith.mulf %110, %107 : vector<8x256xf32>
    %112 = arith.select %109, %107, %111 : vector<8x256xi1>, vector<8x256xf32>
    %cst_48 = arith.constant 0.000000e+00 : f32
    %113 = vector.broadcast %cst_48 : f32 to vector<8x5xf32>
    %114 = vector.extract_strided_slice %112 {offsets = [0, 0], sizes = [8, 251], strides = [1, 1]} : vector<8x256xf32> to vector<8x251xf32>
    %115 = tpu.concatenate %113, %114 in 1 : vector<8x5xf32>, vector<8x251xf32> -> vector<8x256xf32>
    %cst_49 = arith.constant 0.000000e+00 : f32
    %116 = vector.broadcast %cst_49 : f32 to vector<8x5xf32>
    %117 = vector.extract_strided_slice %112 {offsets = [0, 5], sizes = [8, 251], strides = [1, 1]} : vector<8x256xf32> to vector<8x251xf32>
    %118 = tpu.concatenate %117, %116 in 1 : vector<8x251xf32>, vector<8x5xf32> -> vector<8x256xf32>
    %119 = tpu.concatenate %115, %112, %118 in 0 : vector<8x256xf32>, vector<8x256xf32>, vector<8x256xf32> -> vector<24x256xf32>
    %c2 = arith.constant 2 : index
    %c0_50 = arith.constant 0 : index
    %c0_51 = arith.constant 0 : index
    %120 = vector.load %arg1[%c2, %c0_50, %c0_51] : memref<3x8x24xf32, #tpu.memory_space<vmem>>, vector<1x8x24xf32>
    %121 = vector.shape_cast %120 : vector<1x8x24xf32> to vector<8x24xf32>
    %cst_52 = arith.constant dense<0.000000e+00> : vector<8x256xf32>
    %122 = tpu.matmul %121, %119, %cst_52 {dimension_numbers = #tpu.dot_dimension_numbers<[1], [0], [0], [1], [0, 0, 1, 1], [], []>} : vector<8x24xf32>, vector<24x256xf32>, vector<8x256xf32> -> vector<8x256xf32>
    %c2_53 = arith.constant 2 : index
    %c0_54 = arith.constant 0 : index
    %c0_55 = arith.constant 0 : index
    %123 = vector.load %arg2[%c2_53, %c0_54, %c0_55] : memref<3x8x1xf32, #tpu.memory_space<vmem>>, vector<1x8x1xf32>
    %124 = vector.shape_cast %123 : vector<1x8x1xf32> to vector<8x1xf32>
    %125 = vector.broadcast %124 : vector<8x1xf32> to vector<8x256xf32>
    %126 = arith.addf %122, %125 : vector<8x256xf32>
    %127 = vector.broadcast %21 : vector<1x256xf32> to vector<8x256xf32>
    %128 = arith.mulf %126, %127 : vector<8x256xf32>
    %cst_56 = arith.constant 0.000000e+00 : f32
    %129 = vector.broadcast %cst_56 : f32 to vector<8x256xf32>
    %130 = arith.cmpf oge, %128, %129 : vector<8x256xf32>
    %cst_57 = arith.constant 1.000000e-01 : f32
    %131 = vector.broadcast %cst_57 : f32 to vector<8x256xf32>
    %132 = arith.mulf %131, %128 : vector<8x256xf32>
    %133 = arith.select %130, %128, %132 : vector<8x256xi1>, vector<8x256xf32>
    %cst_58 = arith.constant 0.000000e+00 : f32
    %134 = vector.broadcast %cst_58 : f32 to vector<8x1xf32>
    %135 = vector.extract_strided_slice %133 {offsets = [0, 0], sizes = [8, 255], strides = [1, 1]} : vector<8x256xf32> to vector<8x255xf32>
    %136 = tpu.concatenate %134, %135 in 1 : vector<8x1xf32>, vector<8x255xf32> -> vector<8x256xf32>
    %cst_59 = arith.constant 0.000000e+00 : f32
    %137 = vector.broadcast %cst_59 : f32 to vector<8x1xf32>
    %138 = vector.extract_strided_slice %133 {offsets = [0, 1], sizes = [8, 255], strides = [1, 1]} : vector<8x256xf32> to vector<8x255xf32>
    %139 = tpu.concatenate %138, %137 in 1 : vector<8x255xf32>, vector<8x1xf32> -> vector<8x256xf32>
    %140 = tpu.concatenate %136, %133, %139 in 0 : vector<8x256xf32>, vector<8x256xf32>, vector<8x256xf32> -> vector<24x256xf32>
    %c2_60 = arith.constant 2 : index
    %c0_61 = arith.constant 0 : index
    %c0_62 = arith.constant 0 : index
    %141 = vector.load %arg3[%c2_60, %c0_61, %c0_62] : memref<3x8x24xf32, #tpu.memory_space<vmem>>, vector<1x8x24xf32>
    %142 = vector.shape_cast %141 : vector<1x8x24xf32> to vector<8x24xf32>
    %cst_63 = arith.constant dense<0.000000e+00> : vector<8x256xf32>
    %143 = tpu.matmul %142, %140, %cst_63 {dimension_numbers = #tpu.dot_dimension_numbers<[1], [0], [0], [1], [0, 0, 1, 1], [], []>} : vector<8x24xf32>, vector<24x256xf32>, vector<8x256xf32> -> vector<8x256xf32>
    %c2_64 = arith.constant 2 : index
    %c0_65 = arith.constant 0 : index
    %c0_66 = arith.constant 0 : index
    %144 = vector.load %arg4[%c2_64, %c0_65, %c0_66] : memref<3x8x1xf32, #tpu.memory_space<vmem>>, vector<1x8x1xf32>
    %145 = vector.shape_cast %144 : vector<1x8x1xf32> to vector<8x1xf32>
    %146 = vector.broadcast %145 : vector<8x1xf32> to vector<8x256xf32>
    %147 = arith.addf %143, %146 : vector<8x256xf32>
    %148 = vector.broadcast %21 : vector<1x256xf32> to vector<8x256xf32>
    %149 = arith.mulf %147, %148 : vector<8x256xf32>
    %150 = arith.addf %107, %149 : vector<8x256xf32>
    %c0_67 = arith.constant 0 : index
    %c0_68 = arith.constant 0 : index
    %151 = vector.load %arg5[%c0_67, %c0_68] : memref<8x256xf32, #tpu.memory_space<vmem>>, vector<8x256xf32>
    tpu.vector_store %arg5[%c0_67, %c0_68], %150 {strides = array<i32>} : memref<8x256xf32, #tpu.memory_space<vmem>>, vector<8x256xf32>,
    return
  }
}

</mosaic_0001>

<bundles_post_ra>
// kernel: tpu_custom_call.1
= control target key start
LH: loop header
LB: loop body
LE: loop exit
PB: predicated region body
PF: predicated region fallthrough
CT: control target
= control target key end

     0   :  { %10 = vsyncpa [#allocation3], 0  ;;  %s1110_s0 = inlined_call_operand.hbm [shape: f32[8,256], index: 0, kind: input, shape index: {}]   ;;  %s1111_s1 = inlined_call_operand.vmem [shape: f32[3,8,24], index: 1, kind: input, shape index: {}]   ;;  %s1112_s2 = inlined_call_operand.vmem [shape: f32[3,8,1], index: 2, kind: input, shape index: {}]   ;;  %s1113_s3 = inlined_call_operand.vmem [shape: f32[3,8,24], index: 3, kind: input, shape index: {}]   ;;  %s1114_s4 = inlined_call_operand.vmem [shape: f32[3,8,1], index: 4, kind: input, shape index: {}]   ;;  %s1115_s5 = inlined_call_operand.hbm [shape: f32[8,256], index: 5, kind: output, shape index: {}]  }
   0x1   :  { %11 = vsyncpa [#allocation4], 0  ;;  %s903_s18 = smov [#allocation2]   ;;  %s855_s22 = scalar_lea.hbm %s1110_s0, 256 }
   0x2   :  { %s18_s19 = sshll.u32 %s903_s18, 4  ;;  %p856_p0 = scmp.ne.s32.totalorder %s1110_s0, %s855_s22  ;;  %s19_s19 = int_to_ptr.vmem [resolvable:$true] %s18_s19 }
   0x3   :  { %p859_p1 = scmp.lt.u32.totalorder %s855_s22, %s1110_s0 }
   0x5   :  { %p861_p2 = pnand %p859_p1, %p856_p0 }
   0x7   :  { %864 = shalt.err (!%p861_p2)
}
   0x8   :  { %s865_s27 = scalar_lea.vmem %s19_s19, 256  ;;  %p870_p4 = scmp.lt.s32.totalorder %s19_s19, %s19_s19 }
   0x9   :  { %p866_p3 = scmp.ne.s32.totalorder %s19_s19, %s865_s27  ;;  %p871_p5 = scmp.lt.s32.totalorder %s865_s27, %s865_s27 }
   0xb   :  { %p872_p6 = por %p871_p5, %p870_p4 }
   0xd   :  { %p873_p7 = pnand %p872_p6, %p866_p3 }
   0xf   :  { %876 = shalt.err (!%p873_p7)
}
  0x10   :  { %21 = dma.hbm_to_vmem [thread:$0]  %s1110_s0, 256, %s19_s19, [#allocation3]  }
  0x11   :  { %899 = dma.done.wait [#allocation3], 256  }
  0x12   :  { %900 = vsyncadd [#allocation3], 4294967040  ;;  %v956_v0 = vld [vmem:[#allocation2] sm:$0xff]  ;;  %v958_v1 = vld [vmem:[#allocation2 + $0x8] sm:$0xff]  ;;  %v904_v6 = vmov 0.0   ;;  %s905_s0 = smov 127   ;;  %v35_v21 = vlaneseq }
  0x13   :  { %vm68_vm0 = vcmp.ge.f32.partialorder %v956_v0, 0.0  ;;  %vm69_vm1 = vcmp.ge.f32.partialorder %v958_v1, 0.0  ;;  %v70_v2 = vmul.f32 0.1, %v956_v0  ;;  %v71_v3 = vmul.f32 0.1, %v958_v1  ;;  %169 = vmatprep.mubr.f32.mxu0 %v904_v6  ;;  %276 = vmatprep.mubr.f32.mxu1 %v904_v6 }
  0x14   :  { %v906_v8 = vmov 0   ;;  %v95_v9 = vld [vmem:[%s1112_s2] sm:$0xff]  ;;  %s907_s7 = smov 1   ;;  %vm80_vm2 = vcmask 7168   ;;  %vm908_vm4 = vmmov 1   ;;  %vm89_vm6 = vcmask 1039360  }
  0x15   :  { %v72_v4 = vsel %vm68_vm0, %v956_v0, %v70_v2  ;;  %v73_v5 = vsel %vm69_vm1, %v958_v1, %v71_v3  ;;  %828 = vset.pattern.permute.xlu1 %v906_v8  ;;  %854 = vset.pattern.permute.xlu0 %v906_v8  ;;  %vm750_vm3 = vmneg %vm80_vm2  ;;  %v94_v20 = vld [vmem:[%s1111_s1] sm:$0xff]  ;;  %vm101_vm7 = vcmask 195584   ;;  %v36_v22 = vand.u32 127, %v35_v21  ;;  %s909_s14 = smov 125   ;;  %s910_s17 = smov 3  }
  0x16   :  { %v823_v7 = vpack.i.bf16 %v73_v5, %v72_v4  ;;  %87 = vrot.lane.b32.xlu1 %v73_v5, %s905_s0  ;;  %vm977_vm5 = vmpackc.low %vm908_vm4, %vm750_vm3  ;;  %v203_v39 = vld [vmem:[%s1114_s4] sm:$0xff]  ;;  %vm299_vm14 = vcmask 23552   ;;  %vm308_vm1 = vcmask 1022976   ;;  %s911_s24 = smov 123   ;;  %s912_s27 = smov 5  }
  0x17   :  { %v37_v23 = vadd.s32 128, %v36_v22  ;;  %vm62_vm8 = vcmp.lt.s32.totalorder %v36_v22, 16  ;;  %v202_v48 = vld [vmem:[%s1113_s3] sm:$0xff]  ;;  %vm760_vm15 = vmneg %vm299_vm14 }
  0x18   :  { %824 = vrot.lane.b32.xlu0 %v823_v7, %s907_s7  ;;  %v991_v26 = vsel %vm62_vm8, 1.0, %v904_v6  ;;  %vm795_vm0 = vmpackc.low %vm908_vm4, %vm760_vm15 }
  0x19   :  { %v49_v24 = vand.u32 127, %v37_v23 }
  0x1a   :  { %98 = vperm.xlu1 %828, %v95_v9  }
  0x1b   :  { %vm63_vm9 = vcmp.lt.s32.totalorder %v49_v24, 16 }
  0x1c   :  { %85 = vrot.lane.b32.xlu0 %v72_v4, %s905_s0  ;;  %v994_v29 = vsel %vm63_vm9, 1.0, %v904_v6 }
  0x88   :  { %v88_v17 = vpop.permute.xlu1 %87 }
  0x8a   :  { %v825_v10 = vpop.permute.xlu0 %824 }
  0x8b   :  { %v827_v11 = vunpack.i.h.bf16 %v825_v10  ;;  %v826_v12 = vunpack.i.l.bf16 %v825_v10  ;;  %v758_v10 = vld [vmem:[%s1111_s1 + $0x8] sm:$0xff] }
  0x8d   :  { %v81_v13 = vsel %vm80_vm2, %v826_v12, %v827_v11  ;;  %v784_v16 = vpack.c.bf16 %v72_v4, %v826_v12 }
  0x8e   :  { %v782_v14 = vpack.c.bf16 %v73_v5, %v81_v13  ;;  %v86_v18 = vpop.permute.xlu0 %85 }
  0x8f   :  { %v90_v19 = vsel %vm89_vm6, %v86_v18, %v88_v17 }
  0x90   :  { %783 = vmatprep.subr.bf16.mxu0 %v782_v14 }
  0x91   :  { %786 = vmatpush1.bf16.msk.msra.mxu0 %vm977_vm5, %v784_v16 }
  0x92   :  { %752 = vmatprep.subr.msk.mxu0 %vm89_vm6, %v88_v17 }
  0x95   :  { %110 = vmatpush1.msra.mxu0 %v90_v19 }
  0x96   :  { %753 = vmatmul.mubr.msk.f32.vlgmr.msra.gmra.mrb[0].mxu0 %vm101_vm7, %v94_v20 }
  0x97   :  { %389 = vmatprep.mubr.f32.mxu0 %v904_v6 }
  0x99   :  { %v99_v25 = vpop.permute.xlu1 %98 }
 0x169   :  { %v171_v27 = vpop.f32.mrb[0].mxu0 }
 0x16a   :  { %v172_v28 = vadd.f32 %v171_v27, %v99_v25  ;;  %v173_v30 = vpop.f32.mrb[1].mxu0 }
 0x16b   :  { %v174_v31 = vadd.f32 %v173_v30, %v99_v25  ;;  %v765_v25 = vld [vmem:[%s1114_s4 + $0x8] sm:$0xff] }
 0x16c   :  { %v176_v32 = vmul.f32 %v991_v26, %v172_v28 }
 0x16d   :  { %v177_v33 = vmul.f32 %v994_v29, %v174_v31 }
 0x16e   :  { %vm178_vm10 = vcmp.ge.f32.partialorder %v176_v32, 0.0  ;;  %v180_v34 = vmul.f32 0.1, %v176_v32 }
 0x16f   :  { %vm179_vm11 = vcmp.ge.f32.partialorder %v177_v33, 0.0  ;;  %v181_v35 = vmul.f32 0.1, %v177_v33 }
 0x170   :  { %v182_v36 = vsel %vm178_vm10, %v176_v32, %v180_v34 }
 0x171   :  { %194 = vrot.lane.b32.xlu1 %v182_v36, %s905_s0  ;;  %v183_v37 = vsel %vm179_vm11, %v177_v33, %v181_v35  ;;  %vm521_vm11 = vcmask 39936  }
 0x172   :  { %v829_v38 = vpack.i.bf16 %v183_v37, %v182_v36 }
 0x174   :  { %830 = vrot.lane.b32.xlu0 %v829_v38, %s907_s7 }
 0x175   :  { %206 = vperm.xlu1 %828, %v203_v39  }
 0x178   :  { %196 = vrot.lane.b32.xlu0 %v183_v37, %s905_s0 }
 0x1e3   :  { %v195_v47 = vpop.permute.xlu1 %194 }
 0x1e6   :  { %v831_v40 = vpop.permute.xlu0 %830 }
 0x1e7   :  { %v833_v41 = vunpack.i.h.bf16 %v831_v40  ;;  %v832_v42 = vunpack.i.l.bf16 %v831_v40 }
 0x1e9   :  { %v190_v43 = vsel %vm80_vm2, %v832_v42, %v833_v41  ;;  %v789_v45 = vpack.c.bf16 %v182_v36, %v832_v42  ;;  %v764_v36 = vld [vmem:[%s1113_s3 + $0x8] sm:$0xff] }
 0x1ea   :  { %v787_v44 = vpack.c.bf16 %v183_v37, %v190_v43  ;;  %v197_v46 = vpop.permute.xlu0 %196 }
 0x1eb   :  { %v198_v49 = vsel %vm89_vm6, %v195_v47, %v197_v46 }
 0x1ec   :  { %788 = vmatprep.subr.bf16.mxu1 %v787_v44 }
 0x1ed   :  { %791 = vmatpush1.bf16.msk.msra.mxu1 %vm977_vm5, %v789_v45 }
 0x1ee   :  { %756 = vmatprep.subr.msk.mxu1 %vm89_vm6, %v197_v46 }
 0x1f1   :  { %217 = vmatpush1.msra.mxu1 %v198_v49 }
 0x1f2   :  { %757 = vmatmul.mubr.msk.f32.vlgmr.msra.gmra.mrb[0].mxu1 %vm101_vm7, %v202_v48 }
 0x1f3   :  { %498 = vmatprep.mubr.f32.mxu1 %v904_v6 }
 0x1f4   :  { %v207_v50 = vpop.permute.xlu1 %206 }
 0x2c5   :  { %v278_v51 = vpop.f32.mrb[0].mxu1 }
 0x2c6   :  { %v279_v52 = vadd.f32 %v278_v51, %v207_v50  ;;  %v280_v53 = vpop.f32.mrb[1].mxu1  ;;  %v771_v51 = vld [vmem:[%s1112_s2 + $0x10] sm:$0xff] }
 0x2c7   :  { %v281_v54 = vadd.f32 %v280_v53, %v207_v50 }
 0x2c8   :  { %v283_v55 = vmul.f32 %v991_v26, %v279_v52 }
 0x2c9   :  { %v284_v56 = vmul.f32 %v994_v29, %v281_v54 }
 0x2ca   :  { %v1017_v57 = vadd.f32 %v283_v55, %v956_v0  ;;  %v759_v0 = vld [vmem:[%s1112_s2 + $0x8] sm:$0xff] }
 0x2cb   :  { %v1020_v58 = vadd.f32 %v284_v56, %v958_v1 }
 0x2cc   :  { %vm287_vm12 = vcmp.ge.f32.partialorder %v1017_v57, 0.0  ;;  %v289_v59 = vmul.f32 0.1, %v1017_v57 }
 0x2cd   :  { %vm288_vm13 = vcmp.ge.f32.partialorder %v1020_v58, 0.0  ;;  %v290_v60 = vmul.f32 0.1, %v1020_v58 }
 0x2ce   :  { %v291_v61 = vsel %vm287_vm12, %v1017_v57, %v289_v59  ;;  %vm772_vm12 = vmneg %vm521_vm11 }
 0x2cf   :  { %304 = vrot.lane.b32.xlu1 %v291_v61, %s909_s14  ;;  %v292_v62 = vsel %vm288_vm13, %v1020_v58, %v290_v60  ;;  %vm805_vm13 = vmpackc.low %vm908_vm4, %vm772_vm12  ;;  %v770_v60 = vld [vmem:[%s1111_s1 + $0x10] sm:$0xff] }
 0x2d0   :  { %v834_v63 = vpack.i.bf16 %v292_v62, %v291_v61 }
 0x2d2   :  { %835 = vrot.lane.b32.xlu0 %v834_v63, %s910_s17 }
 0x2d3   :  { %319 = vperm.xlu1 %828, %v759_v0  }
 0x2d6   :  { %306 = vrot.lane.b32.xlu0 %v292_v62, %s909_s14 }
 0x341   :  { %v305_v9 = vpop.permute.xlu1 %304 }
 0x344   :  { %v836_v1 = vpop.permute.xlu0 %835 }
 0x345   :  { %v838_v2 = vunpack.i.h.bf16 %v836_v1  ;;  %v837_v3 = vunpack.i.l.bf16 %v836_v1 }
 0x347   :  { %v300_v4 = vsel %vm299_vm14, %v837_v3, %v838_v2  ;;  %v794_v7 = vpack.c.bf16 %v291_v61, %v837_v3  ;;  %vm530_vm14 = vcmask 1006592  }
 0x348   :  { %v792_v5 = vpack.c.bf16 %v292_v62, %v300_v4  ;;  %v307_v8 = vpop.permute.xlu0 %306 }
 0x349   :  { %v309_v11 = vsel %vm308_vm1, %v305_v9, %v307_v8 }
 0x34a   :  { %793 = vmatprep.subr.bf16.mxu0 %v792_v5 }
 0x34b   :  { %796 = vmatpush1.bf16.msk.msra.mxu0 %vm795_vm0, %v794_v7 }
 0x34c   :  { %762 = vmatprep.subr.msk.mxu0 %vm308_vm1, %v307_v8 }
 0x34f   :  { %330 = vmatpush1.msra.mxu0 %v309_v11  ;;  %v777_v11 = vld [vmem:[%s1114_s4 + $0x10] sm:$0xff] }
 0x350   :  { %763 = vmatmul.mubr.msk.f32.vlgmr.msra.gmra.mrb[2].mxu0 %vm101_vm7, %v758_v10 }
 0x351   :  { %611 = vmatprep.mubr.f32.mxu0 %v904_v6 }
 0x352   :  { %v320_v12 = vpop.permute.xlu1 %319 }
 0x423   :  { %v391_v13 = vpop.f32.mrb[2].mxu0 }
 0x424   :  { %v392_v14 = vadd.f32 %v391_v13, %v320_v12  ;;  %v393_v16 = vpop.f32.mrb[3].mxu0 }
 0x425   :  { %v394_v17 = vadd.f32 %v393_v16, %v320_v12 }
 0x426   :  { %v396_v18 = vmul.f32 %v991_v26, %v392_v14 }
 0x427   :  { %v397_v19 = vmul.f32 %v994_v29, %v394_v17 }
 0x428   :  { %vm398_vm3 = vcmp.ge.f32.partialorder %v396_v18, 0.0  ;;  %v400_v20 = vmul.f32 0.1, %v396_v18 }
 0x429   :  { %vm399_vm8 = vcmp.ge.f32.partialorder %v397_v19, 0.0  ;;  %v401_v21 = vmul.f32 0.1, %v397_v19 }
 0x42a   :  { %v402_v22 = vsel %vm398_vm3, %v396_v18, %v400_v20 }
 0x42b   :  { %414 = vrot.lane.b32.xlu1 %v402_v22, %s905_s0  ;;  %v403_v23 = vsel %vm399_vm8, %v397_v19, %v401_v21  ;;  %v776_v21 = vld [vmem:[%s1113_s3 + $0x10] sm:$0xff] }
 0x42c   :  { %v839_v24 = vpack.i.bf16 %v403_v23, %v402_v22 }
 0x42e   :  { %840 = vrot.lane.b32.xlu0 %v839_v24, %s907_s7 }
 0x42f   :  { %428 = vperm.xlu1 %828, %v765_v25  }
 0x432   :  { %416 = vrot.lane.b32.xlu0 %v403_v23, %s905_s0 }
 0x49d   :  { %v415_v35 = vpop.permute.xlu1 %414 }
 0x4a0   :  { %v841_v27 = vpop.permute.xlu0 %840 }
 0x4a1   :  { %v843_v28 = vunpack.i.h.bf16 %v841_v27  ;;  %v842_v30 = vunpack.i.l.bf16 %v841_v27 }
 0x4a3   :  { %v410_v31 = vsel %vm80_vm2, %v842_v30, %v843_v28  ;;  %v799_v33 = vpack.c.bf16 %v402_v22, %v842_v30 }
 0x4a4   :  { %v797_v32 = vpack.c.bf16 %v403_v23, %v410_v31  ;;  %v417_v34 = vpop.permute.xlu0 %416 }
 0x4a5   :  { %v418_v37 = vsel %vm89_vm6, %v415_v35, %v417_v34 }
 0x4a6   :  { %798 = vmatprep.subr.bf16.mxu1 %v797_v32 }
 0x4a7   :  { %801 = vmatpush1.bf16.msk.msra.mxu1 %vm977_vm5, %v799_v33 }
 0x4a8   :  { %768 = vmatprep.subr.msk.mxu1 %vm89_vm6, %v417_v34 }
 0x4ab   :  { %439 = vmatpush1.msra.mxu1 %v418_v37 }
 0x4ac   :  { %769 = vmatmul.mubr.msk.f32.vlgmr.msra.gmra.mrb[2].mxu1 %vm101_vm7, %v764_v36 }
 0x4ad   :  { %720 = vmatprep.mubr.f32.mxu1 %v904_v6 }
 0x4ae   :  { %v429_v38 = vpop.permute.xlu1 %428 }
 0x57f   :  { %v500_v39 = vpop.f32.mrb[2].mxu1 }
 0x580   :  { %v501_v40 = vadd.f32 %v500_v39, %v429_v38  ;;  %v502_v41 = vpop.f32.mrb[3].mxu1 }
 0x581   :  { %v503_v42 = vadd.f32 %v502_v41, %v429_v38 }
 0x582   :  { %v505_v43 = vmul.f32 %v991_v26, %v501_v40 }
 0x583   :  { %v506_v44 = vmul.f32 %v994_v29, %v503_v42 }
 0x584   :  { %v1058_v45 = vadd.f32 %v505_v43, %v1017_v57 }
 0x585   :  { %v1061_v46 = vadd.f32 %v506_v44, %v1020_v58 }
 0x586   :  { %vm509_vm9 = vcmp.ge.f32.partialorder %v1058_v45, 0.0  ;;  %v511_v47 = vmul.f32 0.1, %v1058_v45 }
 0x587   :  { %vm510_vm10 = vcmp.ge.f32.partialorder %v1061_v46, 0.0  ;;  %v512_v6 = vmul.f32 0.1, %v1061_v46 }
 0x588   :  { %v513_v48 = vsel %vm509_vm9, %v1058_v45, %v511_v47 }
 0x589   :  { %526 = vrot.lane.b32.xlu1 %v513_v48, %s911_s24  ;;  %v514_v49 = vsel %vm510_vm10, %v1061_v46, %v512_v6 }
 0x58a   :  { %v844_v50 = vpack.i.bf16 %v514_v49, %v513_v48 }
 0x58c   :  { %845 = vrot.lane.b32.xlu0 %v844_v50, %s912_s27 }
 0x58d   :  { %541 = vperm.xlu1 %828, %v771_v51  }
 0x590   :  { %528 = vrot.lane.b32.xlu0 %v514_v49, %s911_s24 }
 0x5fb   :  { %v527_v59 = vpop.permute.xlu1 %526 }
 0x5fe   :  { %v846_v52 = vpop.permute.xlu0 %845 }
 0x5ff   :  { %v848_v53 = vunpack.i.h.bf16 %v846_v52  ;;  %v847_v54 = vunpack.i.l.bf16 %v846_v52 }
 0x601   :  { %v522_v55 = vsel %vm521_vm11, %v847_v54, %v848_v53  ;;  %v804_v57 = vpack.c.bf16 %v513_v48, %v847_v54 }
 0x602   :  { %v802_v56 = vpack.c.bf16 %v514_v49, %v522_v55  ;;  %v529_v58 = vpop.permute.xlu0 %528 }
 0x603   :  { %v531_v61 = vsel %vm530_vm14, %v527_v59, %v529_v58 }
 0x604   :  { %803 = vmatprep.subr.bf16.mxu0 %v802_v56 }
 0x605   :  { %806 = vmatpush1.bf16.msk.msra.mxu0 %vm805_vm13, %v804_v57 }
 0x606   :  { %774 = vmatprep.subr.msk.mxu0 %vm530_vm14, %v529_v58 }
 0x609   :  { %552 = vmatpush1.msra.mxu0 %v531_v61 }
 0x60a   :  { %775 = vmatmul.mubr.msk.f32.vlgmr.msra.gmra.mrb[4].mxu0 %vm101_vm7, %v770_v60 }
 0x60c   :  { %v542_v62 = vpop.permute.xlu1 %541 }
 0x6dd   :  { %v613_v63 = vpop.f32.mrb[4].mxu0 }
 0x6de   :  { %v614_v0 = vadd.f32 %v613_v63, %v542_v62  ;;  %v615_v1 = vpop.f32.mrb[5].mxu0 }
 0x6df   :  { %v616_v2 = vadd.f32 %v615_v1, %v542_v62 }
 0x6e0   :  { %v618_v3 = vmul.f32 %v991_v26, %v614_v0 }
 0x6e1   :  { %v619_v4 = vmul.f32 %v994_v29, %v616_v2 }
 0x6e2   :  { %vm620_vm4 = vcmp.ge.f32.partialorder %v618_v3, 0.0  ;;  %v622_v5 = vmul.f32 0.1, %v618_v3 }
 0x6e3   :  { %vm621_vm15 = vcmp.ge.f32.partialorder %v619_v4, 0.0  ;;  %v623_v7 = vmul.f32 0.1, %v619_v4 }
 0x6e4   :  { %v624_v8 = vsel %vm620_vm4, %v618_v3, %v622_v5 }
 0x6e5   :  { %636 = vrot.lane.b32.xlu1 %v624_v8, %s905_s0  ;;  %v625_v9 = vsel %vm621_vm15, %v619_v4, %v623_v7 }
 0x6e6   :  { %v849_v10 = vpack.i.bf16 %v625_v9, %v624_v8 }
 0x6e8   :  { %850 = vrot.lane.b32.xlu0 %v849_v10, %s907_s7 }
 0x6e9   :  { %650 = vperm.xlu1 %828, %v777_v11  }
 0x6ec   :  { %638 = vrot.lane.b32.xlu0 %v625_v9, %s905_s0  ;;  %s913_s0 = smov [#allocation5]  }
 0x6ed   :  { %s739_s6 = sshll.u32 %s913_s0, 4  ;;  %s740_s6 = int_to_ptr.vmem [resolvable:$true] %s739_s6 }
 0x6ee   :  { %s877_s3 = scalar_lea.vmem %s740_s6, 256  ;;  %p882_p9 = scmp.lt.s32.totalorder %s740_s6, %s740_s6 }
 0x6ef   :  { %p878_p8 = scmp.ne.s32.totalorder %s740_s6, %s877_s3  ;;  %p883_p10 = scmp.lt.s32.totalorder %s877_s3, %s877_s3 }
 0x6f1   :  { %p884_p11 = por %p883_p10, %p882_p9 }
 0x6f3   :  { %p885_p12 = pnand %p884_p11, %p878_p8 }
 0x757   :  { %v637_v20 = vpop.permute.xlu1 %636 }
 0x75a   :  { %v851_v12 = vpop.permute.xlu0 %850 }
 0x75b   :  { %v853_v13 = vunpack.i.h.bf16 %v851_v12  ;;  %v852_v14 = vunpack.i.l.bf16 %v851_v12 }
 0x75d   :  { %v632_v16 = vsel %vm80_vm2, %v852_v14, %v853_v13  ;;  %v809_v18 = vpack.c.bf16 %v624_v8, %v852_v14 }
 0x75e   :  { %v807_v17 = vpack.c.bf16 %v625_v9, %v632_v16  ;;  %v639_v19 = vpop.permute.xlu0 %638 }
 0x75f   :  { %v640_v22 = vsel %vm89_vm6, %v637_v20, %v639_v19 }
 0x760   :  { %808 = vmatprep.subr.bf16.mxu1 %v807_v17 }
 0x761   :  { %811 = vmatpush1.bf16.msk.msra.mxu1 %vm977_vm5, %v809_v18 }
 0x762   :  { %780 = vmatprep.subr.msk.mxu1 %vm89_vm6, %v639_v19 }
 0x765   :  { %661 = vmatpush1.msra.mxu1 %v640_v22 }
 0x766   :  { %781 = vmatmul.mubr.msk.f32.vlgmr.msra.gmra.mrb[4].mxu1 %vm101_vm7, %v776_v21 }
 0x768   :  { %v651_v23 = vpop.permute.xlu1 %650 }
 0x839   :  { %v722_v24 = vpop.f32.mrb[4].mxu1 }
 0x83a   :  { %v723_v25 = vadd.f32 %v722_v24, %v651_v23  ;;  %v724_v27 = vpop.f32.mrb[5].mxu1 }
 0x83b   :  { %v725_v28 = vadd.f32 %v724_v27, %v651_v23 }
 0x83c   :  { %v727_v15 = vmul.f32 %v991_v26, %v723_v25 }
 0x83d   :  { %v728_v30 = vmul.f32 %v994_v29, %v725_v28 }
 0x83e   :  { %v729_v31 = vadd.f32 %v727_v15, %v1058_v45 }
 0x83f   :  { %v730_v32 = vadd.f32 %v728_v30, %v1061_v46 }
 0x840   :  { %731 = vst [vmem:[#allocation5] sm:$0xff] %v729_v31 }
 0x841   :  { %732 = vst [vmem:[#allocation5 + $0x8] sm:$0xff] %v730_v32 }
 0x842   :  { %888 = shalt.err (!%p885_p12)
}
 0x843   :  { %s889_s9 = scalar_lea.hbm %s1115_s5, 256 }
 0x844   :  { %p890_p13 = scmp.ne.s32.totalorder %s1115_s5, %s889_s9  ;;  %p893_p0 = scmp.lt.u32.totalorder %s889_s9, %s1115_s5 }
 0x846   :  { %p895_p1 = pnand %p893_p0, %p890_p13 }
 0x848   :  { %898 = shalt.err (!%p895_p1)
}
 0x849   :  { %742 = dma.vmem_to_hbm [thread:$0]  %s740_s6, 256, %s1115_s5, [#allocation4]  }
 0x84a   :  { %901 = dma.done.wait [#allocation4], 256  }
 0x84b   :  { %902 = vsyncadd [#allocation4], 4294967040 }
 0x84c   :  { %746 = vsyncpa [#allocation3], 1 }
 0x84d   :  { %747 = vsyncpa [#allocation4], 1 }

</bundles_post_ra>
